<compile_context>
chip_gen: v7x
topology: tpu7x:2x2x1
jax: 0.10.0
libtpu: 0.0.40
codegen_flags: <defaults>
</compile_context>

<pallas_src>
import jax
import jax.numpy as jnp
import numpy as np
from jax.experimental import pallas as pl
from jax.experimental.pallas import tpu as pltpu

_LANE = 128


def _round_up(x, m):
    return ((x + m - 1) // m) * m


def _dkt_loss_kernel(pred_ref, qid_ref, ans_ref, p_ref, loss_ref):
    pred = pred_ref[...]                                    # (Bb, T, Q) f32
    Bb, T, Q = pred.shape
    Tm1 = T - 1

    qid = qid_ref[...]                                      # (Bb, T) int32; -1 => no question
    a_full = ans_ref[...]                                   # (Bb, T) f32 in {0,1}; 0 at padding

    # p[b, j] = pred[b, j, qid_next[b, j]]   (0 when step j+1 carries no question; column T-1
    # always has qid == -1, so it is masked out automatically).
    q_iota = jax.lax.broadcasted_iota(jnp.int32, (Bb, T, Q), 2)
    mask = q_iota == qid[:, :, None]
    p_full = jnp.sum(jnp.where(mask, pred, 0.0), axis=-1)   # (Bb, T)

    # Trailing-zero trim: keep prefix up to the last index with p > 0 (full T-1 if none).
    col = jax.lax.broadcasted_iota(jnp.int32, (Bb, T), 1)
    last_idx = jnp.max(jnp.where(p_full > 0.0, col, -1), axis=1, keepdims=True)   # (Bb, 1)
    length = jnp.where(last_idx >= 0, last_idx + 1, Tm1)                          # (Bb, 1) int32
    keep = col < length

    # BCELoss: mean over the kept prefix of -(a*log(p) + (1-a)*log(1-p)), logs clamped at -100
    # (matches torch.nn.BCELoss clamping).
    log_p = jnp.maximum(jnp.log(p_full), -100.0)
    log_1mp = jnp.maximum(jnp.log(1.0 - p_full), -100.0)
    bce = -(a_full * log_p + (1.0 - a_full) * log_1mp)
    per_student = (jnp.sum(jnp.where(keep, bce, 0.0), axis=1, keepdims=True)
                   / length.astype(jnp.float32))                                  # (Bb, 1)

    # Outputs: p at lane-width T (writeback is ~1/Q of the block's input traffic; padding the
    # lanes to 128 would require padding pred's time axis, which costs more than it saves),
    # plus one per-block loss scalar as a single lane-dense (1, 8, 128) unmasked store.
    p_ref[...] = p_full
    loss_ref[...] = jnp.broadcast_to(jnp.sum(per_student), loss_ref.shape)


def _vmem_plan():
    """(vmem_limit_bytes, block_budget_bytes) derived from the chip's physical VMEM."""
    cap = None
    try:
        cap = getattr(pltpu.get_tpu_info(), "vmem_capacity_bytes", None)
    except Exception:
        cap = None
    if not cap:
        cap = 64 * 1024 * 1024                         # conservative (v7x-sized) fallback
    vmem_limit = min((cap * 3) // 4, 100 * 1024 * 1024)  # 128 MiB parts -> 96 MiB; v7x -> 48 MiB
    budget = (vmem_limit * 3) // 5                        # headroom for Mosaic scratch / spills
    return int(vmem_limit), int(budget)


def _choose_block_b(B, T, Q, budget_bytes):
    """Largest batch tile whose double-buffered, layout-padded VMEM footprint fits the budget."""
    q_lanes = _round_up(Q, _LANE)      # lane axis is padded to 128 in VMEM regardless
    t_sub = _round_up(T, 8)            # f32 sublane axis pads to 8
    t_lanes = _round_up(T, _LANE)
    per_row = (
        2 * t_sub * q_lanes * 4        # pred input block (f32, double-buffered)
        + 2 * 2 * t_lanes * 4          # qid + ans input blocks (double-buffered)
        + 2 * t_lanes * 4              # p output block (double-buffered)
        + 4 * t_sub * q_lanes * 4      # in-kernel intermediates (iota, mask, masked pred, ...)
    )
    return max(1, int(budget_bytes // max(per_row, 1)))


def dkt_loss_pallas(pred, batch_arr, *, block_b=None):
    """Runs the Pallas kernel; returns (p, a, total_loss) with p/a of shape (B, T-1)."""
    B, T, Q = pred.shape
    assert batch_arr.shape == (B, T, 2 * Q)
    assert T >= 2, "max_step must be >= 2"
    Tm1 = T - 1
    pred = pred.astype(jnp.float32)

    # --- Wrapper-side compression of the one-hot batch into per-step scalars (XLA ops). ---
    # TODO(synk): assumes each time step holds at most one question (strict one-hot rows, the
    # standard DKT data format); multiple questions in a single step would need the full
    # delta dot-product of the original loop.
    correct = batch_arr[:, :, :Q].astype(jnp.float32)
    wrong = batch_arr[:, :, Q:].astype(jnp.float32)
    delta = correct + wrong
    has_q = jnp.sum(delta, axis=-1) > 0.0                                       # (B, T)
    qid = jnp.where(has_q, jnp.argmax(delta, axis=-1).astype(jnp.int32), -1)
    ans = jnp.floor((jnp.sum(correct - wrong, axis=-1) + 1.0) * 0.5)            # (B, T) {0,1}

    # Shift step j -> j+1 once, outside the kernel (tiny (B, T) arrays; no in-kernel rolls).
    qid_next = jnp.concatenate([qid[:, 1:], jnp.full((B, 1), -1, jnp.int32)], axis=1)
    ans_next = jnp.concatenate([ans[:, 1:], jnp.zeros((B, 1), jnp.float32)], axis=1)

    # --- Tile selection (layout-aware, chip-aware). ---
    vmem_limit, budget = _vmem_plan()
    bb = _choose_block_b(B, T, Q, budget) if block_b is None else int(block_b)
    bb = max(1, min(bb, B))
    if B >= 16:
        # Guarantee >= 2 grid blocks so both v7x TensorCores get work (negligible cost on 1-TC).
        bb = min(bb, max(8, ((B // 2) // 8) * 8))
    if bb < B and bb % 8 != 0:                  # sublane alignment for the (bb, T) blocks
        bb = min(_round_up(bb, 8), B)
    B_pad = _round_up(B, bb)
    if B_pad != B:                              # zero rows are loss-neutral (p == a == bce == 0)
        pad2 = ((0, B_pad - B), (0, 0))
        pred = jnp.pad(pred, ((0, B_pad - B), (0, 0), (0, 0)))
        qid_next = jnp.pad(qid_next, pad2, constant_values=-1)
        ans_next = jnp.pad(ans_next, pad2)
    grid = (B_pad // bb,)

    out_shapes = (
        jax.ShapeDtypeStruct((B_pad, T), jnp.float32),           # p (columns >= T-1 are 0)
        jax.ShapeDtypeStruct((grid[0], 8, _LANE), jnp.float32),  # per-block loss (lane-dense)
    )
    p_all, loss_blocks = pl.pallas_call(
        _dkt_loss_kernel,
        out_shape=out_shapes,
        grid=grid,
        in_specs=[
            pl.BlockSpec((bb, T, Q), lambda i: (i, 0, 0)),
            pl.BlockSpec((bb, T), lambda i: (i, 0)),
            pl.BlockSpec((bb, T), lambda i: (i, 0)),
        ],
        out_specs=(
            pl.BlockSpec((bb, T), lambda i: (i, 0)),
            pl.BlockSpec((1, 8, _LANE), lambda i: (i, 0, 0)),
        ),
        compiler_params=pltpu.CompilerParams(
            dimension_semantics=("parallel",),   # independent student blocks (v7x 2-TC sharding)
            vmem_limit_bytes=vmem_limit,
        ),
    )(pred, qid_next, ans_next)

    p = p_all[:B, :Tm1]
    a = ans_next[:B, :Tm1]
    loss = jnp.sum(loss_blocks[:, 0, 0])
    return p, a, loss


def loss_func_forward(pred, batch_arr, *, block_b=None):
    """Equivalent of lossFunc.forward: returns (loss, prediction, ground_truth).

    `loss` stays a device scalar.  The ragged per-student concatenation of prediction /
    ground_truth has a dynamic shape, so that final packing runs host-side as a single
    vectorized mask-pack (no per-student Python loop, no extra device syncs).
    """
    p, a, loss = dkt_loss_pallas(pred, batch_arr, block_b=block_b)
    # TODO(synk): torch.cat of dynamically-trimmed per-student vectors has no static-shape
    # device equivalent; only this packing (which the loss does not depend on) leaves the device.
    p_np, a_np = jax.device_get((p, a))
    Tm1 = p_np.shape[1]
    pos = p_np > 0.0
    any_pos = pos.any(axis=1)
    last = np.where(any_pos, Tm1 - 1 - np.argmax(pos[:, ::-1], axis=1), Tm1 - 1)
    lens = last + 1                              # same trim rule as the kernel / PyTorch loop
    keep = np.arange(Tm1)[None, :] < lens[:, None]
    prediction = jnp.asarray(p_np[keep])         # row-major pick == per-student prefixes in order
    ground_truth = jnp.asarray(a_np[keep])
    return loss, prediction, ground_truth


def _reference(pred, batch_arr, Q, T):
    """Direct numpy transcription of the PyTorch loop, for verification."""
    pred = np.asarray(pred, np.float64)
    bat = np.asarray(batch_arr, np.float64)
    loss = 0.0
    preds, gts = [], []
    for s in range(pred.shape[0]):
        delta = bat[s][:, :Q] + bat[s][:, Q:]
        temp = pred[s][: T - 1] @ delta[1:].T
        p = np.diag(temp).copy()
        a = (((bat[s][:, :Q] - bat[s][:, Q:]).sum(1) + 1) // 2)[1:]
        for i in range(len(p) - 1, -1, -1):
            if p[i] > 0:
                p = p[: i + 1]
                a = a[: i + 1]
                break
        logp = np.maximum(np.log(np.where(p > 0, p, 1.0)) * (p > 0) + (-100.0) * (p <= 0), -100.0)
        log1mp = np.maximum(
            np.log(np.where(p < 1, 1.0 - p, 1.0)) * (p < 1) + (-100.0) * (p >= 1), -100.0
        )
        loss += float(np.mean(-(a * logp + (1 - a) * log1mp)))
        preds.append(p)
        gts.append(a)
    return loss, np.concatenate(preds), np.concatenate(gts)


if __name__ == "__main__":
    B, T, Q = 16, 8, 16          # students (batch), max_step, num_of_questions

    key = jax.random.PRNGKey(0)
    kpred, kq, kc = jax.random.split(key, 3)

    # pred: sigmoid-like probabilities in (0, 1)
    pred = jax.nn.sigmoid(jax.random.normal(kpred, (B, T, Q), dtype=jnp.float32))

    # batch: one-hot question per step split into correct/incorrect halves, with a variable
    # number of valid steps per student (trailing all-zero padding) to exercise the trimming.
    qids = jax.random.randint(kq, (B, T), 0, Q)
    corr = jax.random.bernoulli(kc, 0.5, (B, T)).astype(jnp.float32)
    onehot = jax.nn.one_hot(qids, Q, dtype=jnp.float32)                       # (B, T, Q)
    batch_arr = jnp.concatenate(
        [onehot * corr[..., None], onehot * (1.0 - corr[..., None])], axis=-1
    )                                                                         # (B, T, 2Q)
    lengths = (jnp.arange(B) % (T - 1)) + 2              # valid steps per student in [2, T]
    valid = (jnp.arange(T)[None, :] < lengths[:, None]).astype(jnp.float32)
    batch_arr = batch_arr * valid[..., None]

    # Auto tile selection: B=16 triggers the >=2-block clamp -> grid of 2 "parallel" blocks
    # of 8 students (exercises the pipelined tiling path).
    loss, prediction, ground_truth = loss_func_forward(pred, batch_arr)
    jax.block_until_ready((loss, prediction, ground_truth))

    ref_loss, ref_pred, ref_gt = _reference(pred, batch_arr, Q, T)
    assert prediction.shape == ref_pred.shape and ground_truth.shape == ref_gt.shape
    np.testing.assert_allclose(np.asarray(prediction), ref_pred, rtol=1e-5, atol=1e-5)
    np.testing.assert_allclose(np.asarray(ground_truth), ref_gt, rtol=1e-5, atol=1e-5)
    np.testing.assert_allclose(float(loss), ref_loss, rtol=1e-4, atol=1e-5)

    print("KERNEL_OK")
</pallas_src>

<mosaic_0001>
module attributes {stable_mosaic.version = 11 : i64} {
  func.func @_dkt_loss_kernel(%arg0: i32, %arg1: memref<8x8x16xf32, #tpu.memory_space<vmem>>, %arg2: memref<8x8xi32, #tpu.memory_space<vmem>>, %arg3: memref<8x8xf32, #tpu.memory_space<vmem>>, %arg4: memref<8x8xf32, #tpu.memory_space<vmem>>, %arg5: memref<1x8x128xf32, #tpu.memory_space<vmem>>) attributes {dimension_semantics = [#tpu.dimension_semantics<parallel>], iteration_bounds = array<i64: 2>, scalar_prefetch = 0 : i64, scratch_operands = 0 : i64, tpu.core_type = #tpu.core_type<tc>, window_params = [{transform_indices = @transform_0, window_bounds = array<i64: 8, 8, 16>}, {transform_indices = @transform_1, window_bounds = array<i64: 8, 8>}, {transform_indices = @transform_2, window_bounds = array<i64: 8, 8>}, {transform_indices = @transform_3, window_bounds = array<i64: 8, 8>}, {transform_indices = @transform_4, window_bounds = array<i64: 1, 8, 128>}]} {
    %c0 = arith.constant 0 : index
    %c0_0 = arith.constant 0 : index
    %c0_1 = arith.constant 0 : index
    %0 = vector.load %arg1[%c0, %c0_0, %c0_1] : memref<8x8x16xf32, #tpu.memory_space<vmem>>, vector<8x8x16xf32>
    %c0_2 = arith.constant 0 : index
    %c0_3 = arith.constant 0 : index
    %1 = vector.load %arg2[%c0_2, %c0_3] : memref<8x8xi32, #tpu.memory_space<vmem>>, vector<8x8xi32>
    %c0_4 = arith.constant 0 : index
    %c0_5 = arith.constant 0 : index
    %2 = vector.load %arg3[%c0_4, %c0_5] : memref<8x8xf32, #tpu.memory_space<vmem>>, vector<8x8xf32>
    %3 = tpu.iota {dimensions = array<i32: 2>} : vector<8x8x16xi32>
    %4 = vector.shape_cast %1 : vector<8x8xi32> to vector<8x8x1xi32>
    %5 = vector.broadcast %4 : vector<8x8x1xi32> to vector<8x8x16xi32>
    %6 = arith.cmpi eq, %3, %5 : vector<8x8x16xi32>
    %cst = arith.constant 0.000000e+00 : f32
    %7 = vector.broadcast %cst : f32 to vector<8x8x16xf32>
    %8 = arith.select %6, %0, %7 : vector<8x8x16xi1>, vector<8x8x16xf32>
    %cst_6 = arith.constant dense<0.000000e+00> : vector<8x8xf32>
    %9 = vector.multi_reduction <add>, %8, %cst_6 [2] : vector<8x8x16xf32> to vector<8x8xf32>
    %10 = tpu.iota {dimensions = array<i32: 1>} : vector<8x8xi32>
    %cst_7 = arith.constant 0.000000e+00 : f32
    %11 = vector.broadcast %cst_7 : f32 to vector<8x8xf32>
    %12 = arith.cmpf ogt, %9, %11 : vector<8x8xf32>
    %c-1_i32 = arith.constant -1 : i32
    %13 = vector.broadcast %c-1_i32 : i32 to vector<8x8xi32>
    %14 = arith.select %12, %10, %13 : vector<8x8xi1>, vector<8x8xi32>
    %cst_8 = arith.constant dense<-2147483648> : vector<8xi32>
    %15 = vector.multi_reduction <maxsi>, %14, %cst_8 [1] : vector<8x8xi32> to vector<8xi32>
    %16 = vector.shape_cast %15 : vector<8xi32> to vector<8x1xi32>
    %c0_i32 = arith.constant 0 : i32
    %17 = vector.broadcast %c0_i32 : i32 to vector<8x1xi32>
    %18 = arith.cmpi sge, %16, %17 : vector<8x1xi32>
    %c1_i32 = arith.constant 1 : i32
    %19 = vector.broadcast %c1_i32 : i32 to vector<8x1xi32>
    %20 = arith.addi %16, %19 : vector<8x1xi32>
    %c7_i32 = arith.constant 7 : i32
    %21 = vector.broadcast %c7_i32 : i32 to vector<8x1xi32>
    %22 = arith.select %18, %20, %21 : vector<8x1xi1>, vector<8x1xi32>
    %23 = vector.broadcast %22 : vector<8x1xi32> to vector<8x8xi32>
    %24 = arith.cmpi slt, %10, %23 : vector<8x8xi32>
    %25 = math.log %9 : vector<8x8xf32>
    %cst_9 = arith.constant -1.000000e+02 : f32
    %26 = vector.broadcast %cst_9 : f32 to vector<8x8xf32>
    %27 = arith.maximumf %25, %26 : vector<8x8xf32>
    %cst_10 = arith.constant 1.000000e+00 : f32
    %28 = vector.broadcast %cst_10 : f32 to vector<8x8xf32>
    %29 = arith.subf %28, %9 : vector<8x8xf32>
    %30 = math.log %29 : vector<8x8xf32>
    %cst_11 = arith.constant -1.000000e+02 : f32
    %31 = vector.broadcast %cst_11 : f32 to vector<8x8xf32>
    %32 = arith.maximumf %30, %31 : vector<8x8xf32>
    %33 = arith.mulf %2, %27 : vector<8x8xf32>
    %cst_12 = arith.constant 1.000000e+00 : f32
    %34 = vector.broadcast %cst_12 : f32 to vector<8x8xf32>
    %35 = arith.subf %34, %2 : vector<8x8xf32>
    %36 = arith.mulf %35, %32 : vector<8x8xf32>
    %37 = arith.addf %33, %36 : vector<8x8xf32>
    %cst_13 = arith.constant 0.000000e+00 : f32
    %38 = vector.broadcast %cst_13 : f32 to vector<8x8xf32>
    %39 = arith.subf %38, %37 : vector<8x8xf32>
    %cst_14 = arith.constant 0.000000e+00 : f32
    %40 = vector.broadcast %cst_14 : f32 to vector<8x8xf32>
    %41 = arith.select %24, %39, %40 : vector<8x8xi1>, vector<8x8xf32>
    %cst_15 = arith.constant dense<0.000000e+00> : vector<8xf32>
    %42 = vector.multi_reduction <add>, %41, %cst_15 [1] : vector<8x8xf32> to vector<8xf32>
    %43 = vector.shape_cast %42 : vector<8xf32> to vector<8x1xf32>
    %44 = arith.sitofp %22 : vector<8x1xi32> to vector<8x1xf32>
    %45 = arith.divf %43, %44 : vector<8x1xf32>
    %c0_16 = arith.constant 0 : index
    %c0_17 = arith.constant 0 : index
    %46 = vector.load %arg4[%c0_16, %c0_17] : memref<8x8xf32, #tpu.memory_space<vmem>>, vector<8x8xf32>
    tpu.vector_store %arg4[%c0_16, %c0_17], %9 {strides = array<i32>} : memref<8x8xf32, #tpu.memory_space<vmem>>, vector<8x8xf32>,
    %47 = vector.shape_cast %45 : vector<8x1xf32> to vector<1x8x1xf32>
    %cst_18 = arith.constant dense<0.000000e+00> : vector<1xf32>
    %48 = vector.multi_reduction <add>, %47, %cst_18 [1, 2] : vector<1x8x1xf32> to vector<1xf32>
    %49 = vector.shape_cast %48 : vector<1xf32> to vector<1x1x1xf32>
    %50 = vector.extract %49[0, 0, 0] : f32 from vector<1x1x1xf32>
    %51 = vector.broadcast %50 : f32 to vector<1x8x128xf32>
    %c0_19 = arith.constant 0 : index
    %c0_20 = arith.constant 0 : index
    %c0_21 = arith.constant 0 : index
    %52 = vector.load %arg5[%c0_19, %c0_20, %c0_21] : memref<1x8x128xf32, #tpu.memory_space<vmem>>, vector<1x8x128xf32>
    tpu.vector_store %arg5[%c0_19, %c0_20, %c0_21], %51 {strides = array<i32>} : memref<1x8x128xf32, #tpu.memory_space<vmem>>, vector<1x8x128xf32>,
    return
  }
  func.func @transform_0(%arg0: i32) -> (i32, i32, i32) {
    %c0_i32 = arith.constant 0 : i32
    %c0_i32_0 = arith.constant 0 : i32
    %c0_i32_1 = arith.constant 0 : i32
    return %arg0, %c0_i32, %c0_i32_0 : i32, i32, i32
  }
  func.func @transform_1(%arg0: i32) -> (i32, i32) {
    %c0_i32 = arith.constant 0 : i32
    %c0_i32_0 = arith.constant 0 : i32
    return %arg0, %c0_i32 : i32, i32
  }
  func.func @transform_2(%arg0: i32) -> (i32, i32) {
    %c0_i32 = arith.constant 0 : i32
    %c0_i32_0 = arith.constant 0 : i32
    return %arg0, %c0_i32 : i32, i32
  }
  func.func @transform_3(%arg0: i32) -> (i32, i32) {
    %c0_i32 = arith.constant 0 : i32
    %c0_i32_0 = arith.constant 0 : i32
    return %arg0, %c0_i32 : i32, i32
  }
  func.func @transform_4(%arg0: i32) -> (i32, i32, i32) {
    %c0_i32 = arith.constant 0 : i32
    %c0_i32_0 = arith.constant 0 : i32
    %c0_i32_1 = arith.constant 0 : i32
    return %arg0, %c0_i32, %c0_i32_0 : i32, i32, i32
  }
}

</mosaic_0001>

<bundles_post_ra>
// kernel: tpu_custom_call.1
= control target key start
LH: loop header
LB: loop body
LE: loop exit
PB: predicated region body
PF: predicated region fallthrough
CT: control target
= control target key end

     0   :  { %10 = vsyncpa [#allocation3], 0  ;;  %s1443_s0 = inlined_call_operand.hbm [shape: f32[16,8,16], index: 0, kind: input, shape index: {}]   ;;  %s1444_s1 = inlined_call_operand.vmem [shape: s32[16,8], index: 1, kind: input, shape index: {}]   ;;  %s1445_s2 = inlined_call_operand.vmem [shape: f32[16,8], index: 2, kind: input, shape index: {}]   ;;  %s1446_s3 = inlined_call_operand.vmem [shape: f32[16,8], index: 3, kind: output, shape index: {0}]   ;;  %s1447_s4 = inlined_call_operand.hbm [shape: f32[2,8,128], index: 4, kind: output, shape index: {1}]  }
   0x1   :  { %12 = vsyncpa [#allocation3 + $0x1], 0 }
   0x2   :  { %13 = vsyncpa [#allocation4], 0 }
   0x3   :  { %15 = vsyncpa [#allocation4 + $0x1], 0  ;;  %s1077_s15 = smov 0   ;;  %s1079_s16 = smov 0  }
   0x4   :  { %s1081_s17 = smov 0   ;;  %s1083_s18 = smov 0  }
   0x5 LB: > { %s1098_s19 = sadd.s32 4294967295, %s1045_s18   ;;  %s845_s20 = sadd.s32 4294967294, %s1045_s18   ;;  %s1045_s18 = sphi %s1083_s18, %s1460_s18   ;;  %s1041_s17 = sphi %s1081_s17, %s1459_s17   ;;  %s1037_s16 = sphi %s1079_s16, %s1458_s16   ;;  %s1033_s15 = sphi %s1077_s15, %s1457_s15  }
   0x6   : > { %s1102_s21 = sadd.s32 1, %s1045_s18   ;;  %s28_s22 = sadd.s32 1, %s1041_s17 }
   0x7   : > { %s25_s23 = ssub.s32 %s1045_s18, %s1102_s21  ;;  %p35_p0 = scmp.ne.s32.totalorder %s1041_s17, %s1037_s16 }
   0x8   : > { %p26_p1 = scmp.eq.s32.totalorder %s25_s23, 0  ;;  %p36_p2 = scmp.eq.s32.totalorder %s1045_s18, 0 }
   0x9   : > { %p41_p3 = scmp.ne.s32.totalorder %s1037_s16, %s1033_s15  ;;  %p42_p4 = scmp.eq.s32.totalorder %s1098_s19, 0 }
   0xa   : > { %s1114_s24 = scalar_select %p26_p1, %s1041_s17, %s28_s22  }
   0xb   : > { %p1116_p5 = por %p36_p2, %p35_p0  ;;  %p1120_p6 = por %p42_p4, %p41_p3 }
   0xc   : > { %p143_p7 = scmp.eq.s32.totalorder %s1098_s19, 1  ;;  %p149_p8 = scmp.eq.s32.totalorder %s845_s20, 1 }
   0xd   : > { %p876_p10 = scmp.lt.s32.totalorder %s1045_s18, 2  ;;  %s169_s29 = sand.u32 1, %s1041_s17  }
   0xe   : > { %p1127_p11 = por %p143_p7, %p35_p0  ;;  %p1131_p12 = por %p149_p8, %p41_p3 }
   0xf   : > { %s861_s30 = sshll.u32 %s1045_s18, 10  ;;  %s848_s5 = sshll.u32 %s169_s29, 6 }
  0x10   : > { %s1451_s27 = scalar_select %p1127_p11, 1, 0 }
  0x11   : > { %s1452_s28 = scalar_select %p1131_p12, 1, 0 }
  0x12   : > { %s1140_s8 = scalar_lea.hbm %s1443_s0, %s861_s30  ;;  %s173_s9 = scalar_lea.vmem [#allocation2], %s848_s5 }
  0x13   : > { %s180_s10 = sshll.u32 %s173_s9, 4  ;;  %p1144_p13 = pnand %p876_p10, %p1116_p5  ;;  %s1148_s10 = int_to_ptr.vmem [resolvable:$true] %s180_s10 }
  0x14   : > { %s1150_s12 = scalar_lea.sflag [#allocation3], %s169_s29  ;;  %s949_s13 = scalar_lea.hbm %s1140_s8, 1024 }
  0x15   : > { %p950_p0 = scmp.ne.s32.totalorder %s1140_s8, %s949_s13  ;;  %p951_p1 = pneg %p1144_p13 }
  0x16   : > { %s954_s22 = scalar_lea.hbm %s1443_s0, 2048  ;;  %p955_p4 = scmp.lt.u32.totalorder %s1140_s8, %s1443_s0 }
  0x17   : > { %p952_p2 = pnand %p951_p1, %p950_p0  ;;  %p956_p5 = scmp.lt.u32.totalorder %s954_s22, %s949_s13 }
  0x18   : > { %p958_p8 = scmp.lt.u32.totalorder %s949_s13, %s1140_s8 }
  0x19   : > { %p953_p3 = pneg %p952_p2  ;;  %p957_p7 = por %p956_p5, %p955_p4 }
  0x1b   : > { %p959_p10 = por %p958_p8, %p957_p7 }
  0x1d   : > { %p960_p9 = pnand %p959_p10, %p953_p3 }
  0x1f   : > { %963 = shalt.err (!%p960_p9)
}
  0x20   : > { %s964_s29 = scalar_lea.vmem %s1148_s10, 1024  ;;  %s1047_s30 = smov [#allocation2]  }
  0x21   : > { %p965_p0 = scmp.ne.s32.totalorder %s1148_s10, %s964_s29  ;;  %s969_s5 = sshll.u32 %s1047_s30, 4  ;;  %s970_s5 = int_to_ptr.vmem [resolvable:$false] %s969_s5 }
  0x22   : > { %s971_s6 = scalar_lea.vmem %s970_s5, 2048  ;;  %p972_p11 = scmp.lt.s32.totalorder %s1148_s10, %s970_s5 }
  0x23   : > { %p967_p2 = pnand %p965_p0, %p951_p1  ;;  %p973_p4 = scmp.lt.s32.totalorder %s971_s6, %s964_s29 }
  0x25   : > { %p968_p12 = pneg %p967_p2  ;;  %p974_p5 = por %p973_p4, %p972_p11 }
  0x27   : > { %p975_p7 = pnand %p974_p5, %p968_p12 }
  0x29   : > { %978 = shalt.err (!%p975_p7)
}
  0x2a   : > { %s1048_s7 = smov 128   ;;  %s1049_s9 = smov 8  }
  0x2b   : > { %871 = dma.hbm_to_vmem [thread:$0]  (!%p1144_p13), %s1140_s8, 1024, %s1148_s10, %s1150_s12, %s1048_s7, %s1048_s7, %s1049_s9  }
  0x2c   : > { %p851_p9 = scmp.ge.s32.totalorder %s1045_s18, 1  ;;  %p202_p1 = scmp.lt.s32.totalorder %s1045_s18, 3 }
  0x2e   : > { %p203_p3 = pnand %p851_p9, %p202_p1 }
  0x2f   : > { %s1181_s13 = sand.u32 (!%p203_p3), 1, %s1037_s16  }
  0x30   : > { %206 = sbr.rel (%p203_p3) target bundleno = 1162 (0x48a), region = 32  ;;  %s852_s14 = sshll.u32 (!%p203_p3), %s1181_s13, 6 }
  0x31   : > { %s209_s20 = scalar_lea.sflag (!%p203_p3), [#allocation3], %s1181_s13  ;;  %s1185_s22 = scalar_lea.vmem (!%p203_p3), [#allocation2], %s852_s14 }
  0x37   : > { %1024 = dma.done.wait (%p1120_p6), %s209_s20, 1024  }
  0x38   : > { %1026 = vsyncadd (%p1120_p6), %s209_s20, 4294966272  ;;  %p250_p11 = scmp.lt.s32.totalorder %s1098_s19, 1  ;;  %v272_v0 = vlaneseq  ;;  %v262_v20 = vld [vmem:[%s1185_s22] sm:$0xff]  ;;  %v264_v21 = vld [vmem:[%s1185_s22 + $0x10] sm:$0xff]  ;;  %vm346_vm0 = vcmask 130048   ;;  %v1050_v52 = vmov 0  }
  0x39   : > { %v263_v27 = vld [vmem:[%s1185_s22 + $0x8] sm:$0xff]  ;;  %v265_v28 = vld [vmem:[%s1185_s22 + $0x18] sm:$0xff]  ;;  %v266_v35 = vld [vmem:[%s1185_s22 + $0x20] sm:$0xff]  ;;  %914 = vset.pattern.permute.xlu1 %v1050_v52  ;;  %913 = vset.pattern.permute.xlu0 %v1050_v52  ;;  %vm446_vm9 = vcmask 1041409   ;;  %vm448_vm10 = vcmask 1042434   ;;  %vm450_vm11 = vcmask 1043459  }
  0x3a   : > { %s251_s8 = scalar_select %p250_p11, %s1098_s19, 1  ;;  %v1193_v1 = vshrl.u32 %v272_v0, 7  ;;  %v1209_v19 = vand.u32 127, %v272_v0  ;;  %v267_v36 = vld [vmem:[%s1185_s22 + $0x28] sm:$0xff]  ;;  %v268_v43 = vld [vmem:[%s1185_s22 + $0x30] sm:$0xff]  ;;  %v269_v44 = vld [vmem:[%s1185_s22 + $0x38] sm:$0xff] }
  0x3b   : > { %vm452_vm12 = vcmask 1044484   ;;  %s853_s7 = sshll.u32 %s1181_s13, 3  ;;  %s858_s20 = sshll.u32 %s1098_s19, 7 }
  0x3c   : > { %s1195_s10 = sshll.u32 %s251_s8, 3  ;;  %v276_v2 = vsub.s32 0, %v1193_v1  ;;  %v290_v3 = vsub.s32 2, %v1193_v1  ;;  %v283_v4 = vsub.s32 1, %v1193_v1  ;;  %v297_v5 = vsub.s32 3, %v1193_v1  ;;  %s248_s9 = scalar_lea.vmem [#allocation5], %s853_s7 }
  0x3d   : > { %s253_s23 = scalar_lea.vmem %s1444_s1, %s1195_s10  ;;  %v304_v11 = vsub.s32 4, %v1193_v1  ;;  %v311_v12 = vsub.s32 5, %v1193_v1  ;;  %v318_v15 = vsub.s32 6, %v1193_v1  ;;  %v325_v16 = vsub.s32 7, %v1193_v1  ;;  %s257_s29 = scalar_lea.vmem %s1445_s2, %s1195_s10 }
  0x3e   : > { %v270_v6 = vld [vmem:[%s253_s23] sm:$0xff]  ;;  %v1246_v57 = vsub.s32 %v1209_v19, %v1193_v1  ;;  %s261_s6 = scalar_lea.vmem %s1446_s3, %s1195_s10  ;;  %s727_s14 = sshll.u32 %s248_s9, 4  ;;  %s1396_s14 = int_to_ptr.vmem [resolvable:$true] %s727_s14 }
  0x3f   : > { %v277_v7 = vrot.slane %v270_v6, %v276_v2  ;;  %v291_v8 = vrot.slane %v270_v6, %v290_v3  ;;  %v284_v9 = vrot.slane %v270_v6, %v283_v4  ;;  %v298_v10 = vrot.slane %v270_v6, %v297_v5  ;;  %s1401_s11 = scalar_lea.hbm %s1447_s4, %s858_s20  ;;  %s711_s12 = scalar_lea.sflag [#allocation4], %s1181_s13 }
  0x40   : > { %v305_v13 = vrot.slane %v270_v6, %v304_v11  ;;  %v312_v14 = vrot.slane %v270_v6, %v311_v12  ;;  %v319_v17 = vrot.slane %v270_v6, %v318_v15  ;;  %v326_v18 = vrot.slane %v270_v6, %v325_v16  ;;  %s979_s23 = scalar_lea.vmem %s1396_s14, 128  ;;  %p1454_p12 = scmp.ne.s32.totalorder %s1451_s27, 0 }
  0x41   : > { %279 = vbcast.lane.b32.xlu0 %v277_v7, 256  ;;  %293 = vbcast.lane.b32.xlu1 %v291_v8, 256  ;;  %p980_p6 = scmp.ne.s32.totalorder %s1396_s14, %s979_s23  ;;  %s1051_s19 = smov [#allocation5]  }
  0x42   : > { %s983_s26 = sshll.u32 %s1051_s19, 4  ;;  %s984_s26 = int_to_ptr.vmem [resolvable:$false] %s983_s26 }
  0x43   : > { %p981_p13 = pnand %p980_p6, %p1454_p12  ;;  %s985_s25 = scalar_lea.vmem %s984_s26, 256 }
  0x44   : > { %p986_p10 = scmp.lt.s32.totalorder %s1396_s14, %s984_s26  ;;  %p987_p0 = scmp.lt.s32.totalorder %s985_s25, %s979_s23 }
  0x45   : > { %286 = vbcast.lane.b32.xlu0 %v284_v9, 256  ;;  %300 = vbcast.lane.b32.xlu1 %v298_v10, 256  ;;  %p982_p8 = pneg %p981_p13 }
  0x46   : > { %p988_p2 = por %p987_p0, %p986_p10 }
  0x48   : > { %p989_p4 = pnand %p988_p2, %p982_p8 }
  0x49   : > { %307 = vbcast.lane.b32.xlu0 %v305_v13, 256  ;;  %314 = vbcast.lane.b32.xlu1 %v312_v14, 256 }
  0x4d   : > { %321 = vbcast.lane.b32.xlu0 %v319_v17, 256  ;;  %328 = vbcast.lane.b32.xlu1 %v326_v18, 256 }
  0xb3   : > { %v280_v22 = vpop.permute.xlu0 %279  ;;  %v294_v23 = vpop.permute.xlu1 %293 }
  0xb4   : > { %vm330_vm1 = vcmp.eq.s32.totalorder %v1209_v19, %v280_v22  ;;  %vm332_vm2 = vcmp.eq.s32.totalorder %v1209_v19, %v294_v23 }
  0xb5   : > { %v338_v24 = vsel %vm330_vm1, %v262_v20, 0.0  ;;  %v340_v25 = vsel %vm332_vm2, %v264_v21, 0.0  ;;  %vm454_vm2 = vcmask 1045509  }
  0xb6   : > { %v347_v26 = vsel %vm346_vm0, %v338_v24, 0.0  ;;  %v353_v31 = vsel %vm346_vm0, %v340_v25, 0.0 }
  0xb7   : > { %v287_v29 = vpop.permute.xlu0 %286  ;;  %348 = vadd.xlane.f32.xlu0 %v347_v26  ;;  %v301_v30 = vpop.permute.xlu1 %300 }
  0xb8   : > { %vm331_vm3 = vcmp.eq.s32.totalorder %v1209_v19, %v287_v29  ;;  %vm333_vm4 = vcmp.eq.s32.totalorder %v1209_v19, %v301_v30 }
  0xb9   : > { %v339_v32 = vsel %vm331_vm3, %v263_v27, 0.0  ;;  %v341_v33 = vsel %vm333_vm4, %v265_v28, 0.0  ;;  %vm456_vm3 = vcmask 1046534   ;;  %vm458_vm4 = vcmask 1047559  }
  0xba   : > { %v350_v34 = vsel %vm346_vm0, %v339_v32, 0.0  ;;  %v356_v39 = vsel %vm346_vm0, %v341_v33, 0.0 }
  0xbb   : > { %v308_v37 = vpop.permute.xlu0 %307  ;;  %351 = vadd.xlane.f32.xlu1 %v350_v34  ;;  %354 = vadd.xlane.f32.xlu0 %v353_v31  ;;  %v315_v38 = vpop.permute.xlu1 %314 }
  0xbc   : > { %vm334_vm5 = vcmp.eq.s32.totalorder %v1209_v19, %v308_v37  ;;  %vm335_vm6 = vcmp.eq.s32.totalorder %v1209_v19, %v315_v38 }
  0xbd   : > { %v342_v40 = vsel %vm334_vm5, %v266_v35, 0.0  ;;  %v343_v41 = vsel %vm335_vm6, %v267_v36, 0.0  ;;  %vm460_vm6 = vcmask 64512  }
  0xbe   : > { %v359_v42 = vsel %vm346_vm0, %v342_v40, 0.0  ;;  %v362_v47 = vsel %vm346_vm0, %v343_v41, 0.0 }
  0xbf   : > { %v322_v45 = vpop.permute.xlu0 %321  ;;  %360 = vadd.xlane.f32.xlu1 %v359_v42  ;;  %357 = vadd.xlane.f32.xlu0 %v356_v39  ;;  %v329_v46 = vpop.permute.xlu1 %328 }
  0xc0   : > { %vm336_vm7 = vcmp.eq.s32.totalorder %v1209_v19, %v322_v45  ;;  %vm337_vm8 = vcmp.eq.s32.totalorder %v1209_v19, %v329_v46 }
  0xc1   : > { %v344_v48 = vsel %vm336_vm7, %v268_v43, 0.0  ;;  %v345_v49 = vsel %vm337_vm8, %v269_v44, 0.0 }
  0xc2   : > { %v365_v50 = vsel %vm346_vm0, %v344_v48, 0.0  ;;  %v368_v51 = vsel %vm346_vm0, %v345_v49, 0.0 }
  0xc3   : > { %366 = vadd.xlane.f32.xlu1 %v365_v50  ;;  %363 = vadd.xlane.f32.xlu0 %v362_v47 }
  0xc7   : > { %369 = vadd.xlane.f32.xlu0 %v368_v51 }
  0xd4   : > { %380 = vbcast.lane.b32.xlu1 %v1209_v19, 256 }
 0x144   : > { %v1236_v53 = vpop.xlane.xlu0 %348 }
 0x145   : > { %915 = vlog2.f32 %v1236_v53  ;;  %v504_v54 = vsub.f32 1.0, %v1236_v53  ;;  %v655_v63 = vrot.slane %v1236_v53, %v1246_v57  ;;  %vm371_vm14 = vcmp.gt.f32.partialorder %v1236_v53, 0.0 }
 0x147   : > { %917 = vlog2.f32 %v504_v54 }
 0x148   : > { %v1240_v55 = vpop.xlane.xlu1 %351  ;;  %v1242_v56 = vpop.xlane.xlu0 %354 }
 0x149   : > { %919 = vlog2.f32 %v1240_v55  ;;  %v505_v58 = vsub.f32 1.0, %v1240_v55  ;;  %v506_v59 = vsub.f32 1.0, %v1242_v56  ;;  %v659_v60 = vrot.slane %v1240_v55, %v1246_v57 }
 0x14a   : > { %921 = vlog2.f32 %v1242_v56  ;;  %v663_v2 = vrot.slane %v1242_v56, %v1246_v57  ;;  %vm372_vm13 = vcmp.gt.f32.partialorder %v1240_v55, 0.0  ;;  %vm373_vm15 = vcmp.gt.f32.partialorder %v1242_v56, 0.0 }
 0x14b   : > { %923 = vlog2.f32 %v505_v58  ;;  %v684_v5 = vsel %vm446_vm9, %v659_v60, %v655_v63 }
 0x14c   : > { %925 = vlog2.f32 %v506_v59  ;;  %v1254_v61 = vpop.xlane.xlu1 %360  ;;  %v1256_v62 = vpop.xlane.xlu0 %357  ;;  %v685_v14 = vsel %vm448_vm10, %v663_v2, %v684_v5 }
 0x14d   : > { %927 = vlog2.f32 %v1254_v61  ;;  %v508_v0 = vsub.f32 1.0, %v1254_v61  ;;  %v507_v1 = vsub.f32 1.0, %v1256_v62  ;;  %v667_v4 = vrot.slane %v1256_v62, %v1246_v57 }
 0x14e   : > { %929 = vlog2.f32 %v1256_v62  ;;  %v671_v13 = vrot.slane %v1254_v61, %v1246_v57  ;;  %vm374_vm0 = vcmp.gt.f32.partialorder %v1256_v62, 0.0  ;;  %vm375_vm1 = vcmp.gt.f32.partialorder %v1254_v61, 0.0 }
 0x14f   : > { %v916_v3 = vpop.eup %915  ;;  %931 = vlog2.f32 %v508_v0  ;;  %v686_v16 = vsel %vm450_vm11, %v667_v4, %v685_v14 }
 0x150   : > { %v481_v6 = vmul.f32 0.6931472, %v916_v3  ;;  %933 = vlog2.f32 %v507_v1  ;;  %v1269_v7 = vpop.xlane.xlu1 %366  ;;  %v1271_v8 = vpop.xlane.xlu0 %363  ;;  %v1304_v41 = vsel %vm452_vm12, %v671_v13, %v686_v16 }
 0x151   : > { %v918_v9 = vpop.eup %917  ;;  %935 = vlog2.f32 %v1269_v7  ;;  %v510_v10 = vsub.f32 1.0, %v1269_v7  ;;  %v509_v11 = vsub.f32 1.0, %v1271_v8  ;;  %v679_v21 = vrot.slane %v1269_v7, %v1246_v57 }
 0x152   : > { %v513_v12 = vmul.f32 0.6931472, %v918_v9  ;;  %937 = vlog2.f32 %v1271_v8  ;;  %v496_v18 = vmax.f32 %v481_v6, -100.0  ;;  %v675_v31 = vrot.slane %v1271_v8, %v1246_v57 }
 0x153   : > { %v920_v15 = vpop.eup %919  ;;  %939 = vlog2.f32 %v510_v10  ;;  %vm376_vm5 = vcmp.gt.f32.partialorder %v1271_v8, 0.0  ;;  %vm377_vm7 = vcmp.gt.f32.partialorder %v1269_v7, 0.0 }
 0x154   : > { %v922_v17 = vpop.eup %921  ;;  %v483_v20 = vmul.f32 0.6931472, %v920_v15  ;;  %941 = vlog2.f32 %v509_v11  ;;  %v1288_v22 = vpop.permute.xlu1 %380  ;;  %v528_v25 = vmax.f32 %v513_v12, -100.0  ;;  %v547_v38 = vrot.slane %v496_v18, %v1246_v57 }
 0x155   : > { %v1290_v23 = vpop.xlane.xlu0 %369  ;;  %v924_v24 = vpop.eup %923  ;;  %v485_v26 = vmul.f32 0.6931472, %v922_v17  ;;  %v383_v32 = vsel %vm372_vm13, %v1288_v22, 4294967295  ;;  %v382_v36 = vsel %vm371_vm14, %v1288_v22, 4294967295  ;;  %v384_v51 = vsel %vm373_vm15, %v1288_v22, 4294967295 }
 0x156   : > { %943 = vlog2.f32 %v1290_v23  ;;  %v511_v27 = vsub.f32 1.0, %v1290_v23  ;;  %v926_v28 = vpop.eup %925  ;;  %v497_v29 = vmax.f32 %v483_v20, -100.0  ;;  %v515_v30 = vmul.f32 0.6931472, %v924_v24  ;;  %394 = vperm.xlu1 %914, %v383_v32   ;;  %391 = vperm.xlu0 %913, %v382_v36  }
 0x157   : > { %v928_v33 = vpop.eup %927  ;;  %v498_v34 = vmax.f32 %v485_v26, -100.0  ;;  %v517_v35 = vmul.f32 0.6931472, %v926_v28  ;;  %v597_v43 = vrot.slane %v528_v25, %v1246_v57  ;;  %v683_v46 = vrot.slane %v1290_v23, %v1246_v57 }
 0x158   : > { %945 = vlog2.f32 %v511_v27  ;;  %v930_v37 = vpop.eup %929  ;;  %v529_v39 = vmax.f32 %v515_v30, -100.0  ;;  %v489_v40 = vmul.f32 0.6931472, %v928_v33  ;;  %v551_v48 = vrot.slane %v497_v29, %v1246_v57 }
 0x159   : > { %v932_v42 = vpop.eup %931  ;;  %v530_v44 = vmax.f32 %v517_v35, -100.0  ;;  %v487_v45 = vmul.f32 0.6931472, %v930_v37  ;;  %v555_v53 = vrot.slane %v498_v34, %v1246_v57  ;;  %v385_v58 = vsel %vm374_vm0, %v1288_v22, 4294967295  ;;  %v271_v34 = vld [vmem:[%s257_s29] sm:$0xff] }
 0x15a   : > { %v934_v47 = vpop.eup %933  ;;  %v500_v49 = vmax.f32 %v489_v40, -100.0  ;;  %v521_v50 = vmul.f32 0.6931472, %v932_v42  ;;  %397 = vperm.xlu1 %914, %v384_v51   ;;  %v601_v60 = vrot.slane %v529_v39, %v1246_v57  ;;  %v386_v0 = vsel %vm375_vm1, %v1288_v22, 4294967295 }
 0x15b   : > { %v936_v52 = vpop.eup %935  ;;  %v499_v54 = vmax.f32 %v487_v45, -100.0  ;;  %v519_v55 = vmul.f32 0.6931472, %v934_v47  ;;  %v605_v2 = vrot.slane %v530_v44, %v1246_v57  ;;  %v576_v15 = vsel %vm446_vm9, %v551_v48, %v547_v38 }
 0x15c   : > { %v938_v59 = vpop.eup %937  ;;  %v532_v63 = vmax.f32 %v521_v50, -100.0  ;;  %v493_v56 = vmul.f32 0.6931472, %v936_v52  ;;  %v563_v3 = vrot.slane %v500_v49, %v1246_v57  ;;  %v626_v20 = vsel %vm446_vm9, %v601_v60, %v597_v43 }
 0x15d   : > { %v940_v1 = vpop.eup %939  ;;  %v531_v62 = vmax.f32 %v519_v55, -100.0  ;;  %v491_v4 = vmul.f32 0.6931472, %v938_v59  ;;  %v559_v9 = vrot.slane %v499_v54, %v1246_v57  ;;  %v577_v27 = vsel %vm448_vm10, %v555_v53, %v576_v15 }
 0x15e   : > { %v942_v5 = vpop.eup %941  ;;  %v613_v6 = vrot.slane %v532_v63, %v1246_v57  ;;  %v502_v10 = vmax.f32 %v493_v56, -100.0  ;;  %v525_v11 = vmul.f32 0.6931472, %v940_v1  ;;  %400 = vperm.xlu1 %914, %v385_v58   ;;  %v627_v28 = vsel %vm448_vm10, %v605_v2, %v626_v20 }
 0x15f   : > { %v609_v13 = vrot.slane %v531_v62, %v1246_v57  ;;  %v501_v61 = vmax.f32 %v491_v4, -100.0  ;;  %v523_v14 = vmul.f32 0.6931472, %v942_v5  ;;  %v578_v33 = vsel %vm450_vm11, %v559_v9, %v577_v27 }
 0x160   : > { %v944_v12 = vpop.eup %943  ;;  %v534_v16 = vmax.f32 %v525_v11, -100.0  ;;  %v571_v17 = vrot.slane %v502_v10, %v1246_v57  ;;  %v579_v37 = vsel %vm452_vm12, %v563_v3, %v578_v33  ;;  %v688_v38 = vsel %vm454_vm2, %v675_v31, %v1304_v41 }
 0x161   : > { %v495_v18 = vmul.f32 0.6931472, %v944_v12  ;;  %v533_v25 = vmax.f32 %v523_v14, -100.0  ;;  %v567_v26 = vrot.slane %v501_v61, %v1246_v57  ;;  %v628_v36 = vsel %vm450_vm11, %v609_v13, %v627_v28 }
 0x162   : > { %v946_v24 = vpop.eup %945  ;;  %v621_v29 = vrot.slane %v534_v16, %v1246_v57  ;;  %403 = vperm.xlu1 %914, %v386_v0   ;;  %v629_v42 = vsel %vm452_vm12, %v613_v6, %v628_v36  ;;  %v689_v43 = vsel %vm456_vm3, %v679_v21, %v688_v38  ;;  %v585_v41 = vsub.f32 1.0, %v271_v34 }
 0x163   : > { %v503_v30 = vmax.f32 %v495_v18, -100.0  ;;  %v527_v32 = vmul.f32 0.6931472, %v946_v24  ;;  %v617_v35 = vrot.slane %v533_v25, %v1246_v57  ;;  %v690_v44 = vsel %vm458_vm4, %v683_v46, %v689_v43 }
 0x164   : > { %v580_v31 = vsel %vm454_vm2, %v567_v26, %v579_v37  ;;  %v387_v47 = vsel %vm376_vm5, %v1288_v22, 4294967295  ;;  %692 = vst.msk [vmem:[%s261_s6] sm:$0xff] %vm460_vm6, %v690_v44  ;;  %v388_v8 = vsel %vm377_vm7, %v1288_v22, 4294967295  ;;  %vm378_vm8 = vcmp.gt.f32.partialorder %v1290_v23, 0.0 }
 0x165   : > { %v535_v39 = vmax.f32 %v527_v32, -100.0  ;;  %v575_v40 = vrot.slane %v503_v30, %v1246_v57  ;;  %v630_v45 = vsel %vm454_vm2, %v617_v35, %v629_v42  ;;  %v581_v48 = vsel %vm456_vm3, %v571_v17, %v580_v31 }
 0x166   : > { %v631_v49 = vsel %vm456_vm3, %v621_v29, %v630_v45  ;;  %406 = vperm.xlu1 %914, %v387_v47   ;;  %v389_v54 = vsel %vm378_vm8, %v1288_v22, 4294967295 }
 0x167   : > { %v625_v21 = vrot.slane %v535_v39, %v1246_v57  ;;  %v582_v46 = vsel %vm458_vm4, %v575_v40, %v581_v48 }
 0x168   : > { %v584_v51 = vmul.f32 %v582_v46, %v271_v34 }
 0x169   : > { %v632_v50 = vsel %vm458_vm4, %v625_v21, %v631_v49 }
 0x16a   : > { %v634_v52 = vmul.f32 %v632_v50, %v585_v41  ;;  %409 = vperm.xlu1 %914, %v388_v8  }
 0x16c   : > { %v635_v53 = vadd.f32 %v634_v52, %v584_v51 }
 0x16e   : > { %412 = vperm.xlu1 %914, %v389_v54   ;;  %v636_v32 = vsub.f32 0.0, %v635_v53 }
 0x1d5   : > { %v395_v55 = vpop.permute.xlu1 %394  ;;  %v392_v63 = vpop.permute.xlu0 %391 }
 0x1d6   : > { %v421_v0 = vrot.slane %v395_v55, %v1246_v57  ;;  %v417_v7 = vrot.slane %v392_v63, %v1246_v57 }
 0x1d8   : > { %v447_v22 = vsel %vm446_vm9, %v421_v0, %v417_v7 }
 0x1d9   : > { %v398_v58 = vpop.permute.xlu1 %397 }
 0x1da   : > { %v425_v1 = vrot.slane %v398_v58, %v1246_v57 }
 0x1dc   : > { %v449_v4 = vsel %vm448_vm10, %v425_v1, %v447_v22 }
 0x1dd   : > { %v401_v59 = vpop.permute.xlu1 %400 }
 0x1de   : > { %v429_v2 = vrot.slane %v401_v59, %v1246_v57 }
 0x1e0   : > { %v451_v6 = vsel %vm450_vm11, %v429_v2, %v449_v4 }
 0x1e1   : > { %v404_v60 = vpop.permute.xlu1 %403 }
 0x1e2   : > { %v433_v23 = vrot.slane %v404_v60, %v1246_v57 }
 0x1e4   : > { %v453_v9 = vsel %vm452_vm12, %v433_v23, %v451_v6  ;;  %vm693_vm12 = vcmask 7168  }
 0x1e5   : > { %v407_v56 = vpop.permute.xlu1 %406 }
 0x1e6   : > { %v437_v62 = vrot.slane %v407_v56, %v1246_v57 }
 0x1e8   : > { %v455_v11 = vsel %vm454_vm2, %v437_v62, %v453_v9 }
 0x1e9   : > { %v410_v3 = vpop.permute.xlu1 %409 }
 0x1ea   : > { %v441_v5 = vrot.slane %v410_v3, %v1246_v57 }
 0x1ec   : > { %v457_v13 = vsel %vm456_vm3, %v441_v5, %v455_v11 }
 0x1ed   : > { %v413_v10 = vpop.permute.xlu1 %412 }
 0x1ee   : > { %v445_v12 = vrot.slane %v413_v10, %v1246_v57 }
 0x1f0   : > { %v459_v61 = vsel %vm458_vm4, %v445_v12, %v457_v13 }
 0x1f1   : > { %v461_v14 = vsel %vm460_vm6, %v459_v61, 2147483648 }
 0x1f2   : > { %v463_v15 = vshra.s32 %v461_v14, 16  ;;  %v462_v17 = vand.u32 65535, %v461_v14 }
 0x1f4   : > { %v465_v16 = vcvt.s32.f32 %v463_v15  ;;  %v464_v20 = vcvt.s32.f32 %v462_v17 }
 0x1f6   : > { %466 = vmax.xlane.f32.xlu1 %v465_v16 }
 0x283   : > { %v467_v18 = vpop.xlane.xlu1 %466 }
 0x284   : > { %vm468_vm9 = vcmp.eq.f32.partialorder %v465_v16, %v467_v18  ;;  %v473_v25 = vcvt.f32.s32 %v467_v18 }
 0x285   : > { %v469_v24 = vsel %vm468_vm9, %v464_v20, -inf }
 0x286   : > { %470 = vmax.xlane.f32.xlu0 %v469_v24  ;;  %v474_v27 = vshll.u32 %v473_v25, 16 }
 0x313   : > { %v471_v26 = vpop.xlane.xlu0 %470 }
 0x314   : > { %v472_v28 = vcvt.f32.s32 %v471_v26 }
 0x316   : > { %v475_v57 = vadd.s32 %v474_v27, %v472_v28 }
 0x318   : > { %v477_v29 = vadd.s32 1, %v475_v57  ;;  %vm476_vm10 = vcmp.ge.s32.totalorder %v475_v57, 0 }
 0x31a   : > { %v478_v30 = vsel %vm476_vm10, %v477_v29, 7 }
 0x31b   : > { %vm479_vm11 = vcmp.lt.s32.totalorder %v1209_v19, %v478_v30  ;;  %v641_v35 = vcvt.s32.f32 %v478_v30 }
 0x31c   : > { %v637_v33 = vsel %vm479_vm11, %v636_v32, 0.0 }
 0x31d   : > { %v638_v34 = vsel %vm460_vm6, %v637_v33, 0.0  ;;  %947 = vrcp.f32 %v641_v35 }
 0x31e   : > { %639 = vadd.xlane.f32.xlu0 %v638_v34 }
 0x327   : > { %v948_v36 = vpop.eup %947 }
 0x3ab   : > { %v640_v37 = vpop.xlane.xlu0 %639 }
 0x3ac   : > { %v643_v38 = vmul.f32 %v948_v36, %v640_v37 }
 0x3ae   : > { %v694_v39 = vsel %vm693_vm12, %v643_v38, 0.0 }
 0x3af   : > { %695 = vadd.xlane.f32.xlu1 %v694_v39 }
 0x43c   : > { %v696_v40 = vpop.xlane.xlu1 %695 }
 0x43d   : > { %v697_v42 = vrot.slane %v696_v40, 4 }
 0x43f   : > { %v698_v43 = vadd.f32 %v697_v42, %v696_v40 }
 0x441   : > { %v699_v44 = vrot.slane %v698_v43, 2 }
 0x443   : > { %v700_v19 = vadd.f32 %v699_v44, %v698_v43 }
 0x445   : > { %v701_v31 = vrot.slane %v700_v19, 1 }
 0x447   : > { %v702_v41 = vadd.f32 %v701_v31, %v700_v19 }
 0x449   : > { %862 = vpush %v702_v41 }
 0x47a   : > { %s863_s22 = spop %862 }
 0x47b   : > { %v704_v45 = vstv %s863_s22 }
 0x47c   : > { %705 = vst [vmem:[%s248_s9] sm:$0xff] %v704_v45 }
 0x47d   : > { %992 = shalt.err (!%p989_p4)
}
 0x47e   : > { %s993_s13 = scalar_lea.hbm %s1401_s11, 128  ;;  %s997_s5 = scalar_lea.hbm %s1447_s4, 256 }
 0x47f   : > { %p994_p5 = scmp.ne.s32.totalorder %s1401_s11, %s993_s13  ;;  %p998_p1 = scmp.lt.u32.totalorder %s1401_s11, %s1447_s4 }
 0x480   : > { %p999_p3 = scmp.lt.u32.totalorder %s997_s5, %s993_s13  ;;  %p1001_p6 = scmp.lt.u32.totalorder %s993_s13, %s1401_s11 }
 0x481   : > { %p995_p7 = pnand %p994_p5, %p1454_p12 }
 0x482   : > { %p1000_p11 = por %p999_p3, %p998_p1 }
 0x483   : > { %p996_p9 = pneg %p995_p7 }
 0x484   : > { %p1002_p13 = por %p1001_p6, %p1000_p11 }
 0x486   : > { %p1003_p8 = pnand %p1002_p13, %p996_p9 }
 0x488   : > { %1006 = shalt.err (!%p1003_p8)
}
 0x489   : > { %866 = dma.vmem_to_hbm [thread:$0]  (%p1454_p12), %s1396_s14, 128, %s1401_s11, %s711_s12  }
 0x48a PF: > { %s746_s9 = sand.u32 1, %s1033_s15   ;;  %p1455_p10 = scmp.ne.s32.totalorder %s1452_s28, 0 }
 0x48b   : > { %p1456_p0 = scmp.ge.s32.totalorder %s1045_s18, 2  ;;  %s747_s20 = scalar_lea.sflag [#allocation4], %s746_s9 }
 0x48d   : > { %p873_p2 = pnand %p1456_p0, %p1455_p10 }
 0x48f   : > { %1028 = dma.done.wait (!%p873_p2), %s747_s20, 128  }
 0x490   : > { %1030 = vsyncadd (!%p873_p2), %s747_s20, 4294967168  ;;  %p18_p4 = scmp.ge.s32.totalorder %s1102_s21, 4   ;;  %s1457_s15 = smov %s1037_s16 }
 0x491   : > { %s1458_s16 = smov %s1041_s17  ;;  %s1459_s17 = smov %s1114_s24 }
 0x492   : > { %s1460_s18 = smov %s1102_s21  ;;  %20 = sbr.rel (!%p18_p4) target bundleno = 5 (0x5), region = 95 }
 0x499   :  { %752 = vsyncpa [#allocation3], 1 }
 0x49a   :  { %754 = vsyncpa [#allocation3 + $0x1], 1 }
 0x49b   :  { %755 = vsyncpa [#allocation4], 1 }
 0x49c   :  { %757 = vsyncpa [#allocation4 + $0x1], 1 }

</bundles_post_ra>
